<compile_context>
chip_gen: v6e
topology: v6e:2x2x1
jax: 0.10.0
libtpu: 0.0.40
codegen_flags: <defaults>
</compile_context>

<pallas_src>
import functools

import jax
import jax.numpy as jnp
from jax import lax
from jax.experimental import pallas as pl
from jax.experimental.pallas import tpu as pltpu


def _make_smoothed_weights(w0):
    """Replicates the torch weight preprocessing (tiny plain-JAX parameter glue).

    F.conv2d(conv.weight, ones(C_in, C_in, 3, 3) * gaussian, padding=1): every
    "output channel" of that conv is identical and equals the sum over input
    channels of the gaussian-smoothed original weight.
    """
    c_out, c_in, kh, kw = w0.shape
    g = jnp.array([[1., 2., 1.], [2., 4., 2.], [1., 2., 1.]], jnp.float32) / 16.0
    w0p = jnp.pad(w0, ((0, 0), (0, 0), (1, 1), (1, 1)))
    smoothed = jnp.zeros_like(w0)
    for dy in range(3):
        for dx in range(3):
            smoothed = smoothed + g[dy, dx] * w0p[:, :, dy:dy + kh, dx:dx + kw]
    conv_weight = jnp.broadcast_to(smoothed.sum(axis=1, keepdims=True),
                                   (c_out, c_in, kh, kw))
    kernel_diff = conv_weight.sum(axis=(2, 3))          # (C_out, C_in)
    return conv_weight, kernel_diff


def _vmem_capacity_bytes():
    try:
        return int(pltpu.get_tpu_info().vmem_capacity_bytes)
    except Exception:
        return 64 << 20   # conservative fallback (v7x per-TC physical VMEM)


def _step_vmem_bytes(th, w, c_in, c_out, in_item, out_item, single_matmul):
    """Complete per-grid-step VMEM estimate (incl. double-buffered pipeline bufs)."""
    tile = th * w
    b = 2 * c_in * tile * in_item            # main input blocks (x2 pipeline)
    b += 2 * 2 * c_in * w * in_item          # halo-row blocks (x2 pipeline)
    b += 2 * c_out * 9 * c_in * in_item      # fused weights
    b += 2 * 2 * tile * in_item              # edge keep-masks
    b += 2 * c_out * tile * out_item         # output blocks (x2 pipeline)
    b += c_in * (th + 2) * w * in_item       # flat row-slab scratch
    if single_matmul:
        b += 9 * c_in * tile * in_item       # concatenated K=9*c_in operand
    b += c_out * tile * 4                    # f32 matmul result / accumulator
    return b


def _choose_tile_h(n, h, w, c_in, c_out, in_item, out_item, single_matmul,
                   vmem_budget, min_steps=8):
    """Largest row block that (a) divides H, (b) keeps the output lane dim a
    multiple of 128 (or the whole image), (c) fits the VMEM budget and
    (d) leaves enough grid steps for pipelining / megacore sharding."""
    cands = [d for d in range(1, h + 1)
             if h % d == 0 and ((d * w) % 128 == 0 or d == h)]
    fitting = [d for d in cands
               if _step_vmem_bytes(d, w, c_in, c_out, in_item, out_item,
                                   single_matmul) <= vmem_budget]
    if not fitting:
        fitting = [min(cands)]
    for pool in ([d for d in fitting if n * (h // d) >= min_steps],
                 [d for d in fitting if h // d >= 2],
                 fitting):
        if pool:
            return max(pool)
    return h  # unreachable


@functools.partial(jax.jit, static_argnames=("theta", "tile_h", "compute_dtype",
                                              "out_dtype", "single_matmul"))
def conv2d_gaussian_fix(x, w0, theta=0.7, tile_h=None, compute_dtype=None,
                        out_dtype=jnp.float32, single_matmul=None):
    """Forward of Conv2d_Gaussian_fix (3x3, stride=1, padding=1, groups=1, no bias)."""
    n, c_in, h, w = x.shape
    c_out = w0.shape[0]

    if compute_dtype is None:
        # bf16 inputs are the cheap path (recommended on v5e); keep f32 for parity.
        compute_dtype = jnp.bfloat16 if x.dtype == jnp.bfloat16 else jnp.float32
    sm = single_matmul if single_matmul is not None else (c_in < 128)

    # ---- parameter glue (tiny, plain JAX) --------------------------------
    conv_weight, kernel_diff = _make_smoothed_weights(w0.astype(jnp.float32))
    # Fold `- theta * conv1x1(x, kernel_diff)` into the 3x3 center tap: the
    # 1x1 conv reads exactly the x element the (1,1) tap reads.
    if abs(float(theta)) >= 1e-8:               # mirrors math.fabs(theta) < 1e-8
        conv_weight = conv_weight.at[:, :, 1, 1].add(-float(theta) * kernel_diff)
    # w_flat[co, (ky*3 + kx)*c_in + c] = fused_weight[co, c, ky, kx]
    w_flat = conv_weight.transpose(0, 2, 3, 1).reshape(c_out, 9 * c_in)
    w_flat = w_flat.astype(compute_dtype)

    # ---- tiling ----------------------------------------------------------
    in_item = jnp.dtype(compute_dtype).itemsize
    out_item = jnp.dtype(out_dtype).itemsize
    cap = _vmem_capacity_bytes()
    vmem_budget = max(cap // 4, 8 << 20)
    if tile_h is None:
        tile_h = _choose_tile_h(n, h, w, c_in, c_out, in_item, out_item, sm,
                                vmem_budget)
    th = int(tile_h)
    if h % th != 0 or not ((th * w) % 128 == 0 or th == h):
        # TODO(synk): ragged row blocks (no divisor of H with a 128-aligned
        # tile) fall back to whole-image tiles; pad-H support not implemented.
        raise ValueError(f"tile_h={th} must divide H={h} and give a 128-aligned "
                         f"(tile_h*W) output block (or equal H)")
    nr = h // th
    tw = th * w

    used = _step_vmem_bytes(th, w, c_in, c_out, in_item, out_item, sm)
    vmem_limit = int(min(cap, max(2 * used + (4 << 20), 32 << 20)))

    # ---- input glue (no full-image pad, no transpose) ---------------------
    xc = x.astype(compute_dtype)                 # no-op when dtypes match
    x_flat = xc.reshape(n, c_in, h * w)          # free metadata reshape (NCHW order)

    # Halo side stream: for each row block, the image row just above and just
    # below it (zeros at the image top/bottom).  Tiny: 2 rows per block.
    zrow = jnp.zeros((n, 1, c_in, w), compute_dtype)
    if nr > 1:
        tops = xc[:, :, th - 1::th, :][:, :, :nr - 1, :].transpose(0, 2, 1, 3)
        bots = xc[:, :, th::th, :].transpose(0, 2, 1, 3)
        top_rows = jnp.concatenate([zrow, tops], axis=1)     # (n, nr, c_in, w)
        bot_rows = jnp.concatenate([bots, zrow], axis=1)     # (n, nr, c_in, w)
    else:
        top_rows, bot_rows = zrow, zrow
    halo = jnp.concatenate([top_rows, bot_rows], axis=2)     # (n, nr, 2*c_in, w)

    # Horizontal-padding keep-masks (exact 0/1 multiply), one lane per output pixel.
    xs = jnp.arange(tw, dtype=jnp.int32) % w
    edge = jnp.stack([(xs != 0).astype(compute_dtype),        # valid when reading x-1
                      (xs != (w - 1)).astype(compute_dtype)],  # valid when reading x+1
                     axis=0)                                   # (2, tw)

    # ---- kernel -----------------------------------------------------------
    def _body(xm_ref, xh_ref, w_ref, edge_ref, out_ref, slab_ref, acc_ref):
        # Flat, channel-major padded-row window (pixels on lanes, row-major):
        #   lanes [0, w)               : row above the tile (zeros at image top)
        #   lanes [w, (th+1)*w)        : the tile's th rows
        #   lanes [(th+1)*w, (th+2)*w) : row below the tile (zeros at image bottom)
        slab_ref[:, 0:w] = xh_ref[0, 0, 0:c_in, :]
        slab_ref[:, w:(th + 1) * w] = xm_ref[0]
        slab_ref[:, (th + 1) * w:(th + 2) * w] = xh_ref[0, 0, c_in:2 * c_in, :]

        keep = edge_ref[...]
        kl = keep[0:1, :]
        kr = keep[1:2, :]

        if not sm:
            acc_ref[...] = jnp.zeros_like(acc_ref)

        pieces = []
        for dy in (-1, 0, 1):
            base = (dy + 1) * w
            row = slab_ref[:, base:base + tw]            # (c_in, tw), one load per dy
            for dx in (-1, 0, 1):
                if dx == 0:
                    v = row
                elif dx == -1:
                    # out(y,x) needs in(y+dy, x-1); wrapped lanes (x==0) are padding.
                    v = pltpu.roll(row, 1, axis=1) * kl
                else:
                    v = pltpu.roll(row, tw - 1, axis=1) * kr
                if sm:
                    pieces.append(v)
                else:
                    t = (dy + 1) * 3 + (dx + 1)
                    acc_ref[...] += jnp.dot(w_ref[:, t * c_in:(t + 1) * c_in], v,
                                            preferred_element_type=jnp.float32)
        if sm:
            col = jnp.concatenate(pieces, axis=0)        # (9*c_in, tw)
            res = jnp.dot(w_ref[...], col, preferred_element_type=jnp.float32)
        else:
            res = acc_ref[...]
        # Lane-dense store, already in NCHW element order.
        out_ref[0] = res.astype(out_ref.dtype)

    if sm:
        def kernel(xm_ref, xh_ref, w_ref, edge_ref, out_ref, slab_ref):
            _body(xm_ref, xh_ref, w_ref, edge_ref, out_ref, slab_ref, None)
        scratch = [pltpu.VMEM((c_in, (th + 2) * w), compute_dtype)]
    else:
        def kernel(xm_ref, xh_ref, w_ref, edge_ref, out_ref, slab_ref, acc_ref):
            _body(xm_ref, xh_ref, w_ref, edge_ref, out_ref, slab_ref, acc_ref)
        scratch = [pltpu.VMEM((c_in, (th + 2) * w), compute_dtype),
                   pltpu.VMEM((c_out, tw), jnp.float32)]

    out = pl.pallas_call(
        kernel,
        out_shape=jax.ShapeDtypeStruct((n, c_out, h * w), out_dtype),
        grid_spec=pltpu.PrefetchScalarGridSpec(
            num_scalar_prefetch=0,
            grid=(n, nr),
            in_specs=[
                # main rows of image b, row block r (flat NCHW slab: free reshape)
                pl.BlockSpec((1, c_in, tw), lambda b, r: (b, 0, r)),
                # 2 halo rows (zeros baked in at the image top/bottom)
                pl.BlockSpec((1, 1, 2 * c_in, w), lambda b, r: (b, r, 0, 0)),
                # fused 3x3 (+ theta-folded center) weights, resident
                pl.BlockSpec((c_out, 9 * c_in), lambda b, r: (0, 0)),
                # horizontal-padding keep-masks, resident
                pl.BlockSpec((2, tw), lambda b, r: (0, 0)),
            ],
            out_specs=pl.BlockSpec((1, c_out, tw), lambda b, r: (b, 0, r)),
            scratch_shapes=scratch,
        ),
        compiler_params=pltpu.CompilerParams(
            dimension_semantics=("parallel", "parallel"),
            vmem_limit_bytes=vmem_limit),
    )(x_flat, halo, w_flat, edge)

    # Free metadata reshape: (N, C_out, H*W) is already NCHW element order.
    return out.reshape(n, c_out, h, w)


def _reference(x, w0, theta):
    """Pure-JAX (lax.conv) reference for validation."""
    conv_weight, kernel_diff = _make_smoothed_weights(w0.astype(jnp.float32))
    out_normal = lax.conv_general_dilated(
        x, conv_weight, window_strides=(1, 1), padding=((1, 1), (1, 1)),
        dimension_numbers=("NCHW", "OIHW", "NCHW"))
    if abs(theta) < 1e-8:
        return out_normal
    out_diff = lax.conv_general_dilated(
        x, kernel_diff[:, :, None, None], window_strides=(1, 1),
        padding="VALID", dimension_numbers=("NCHW", "OIHW", "NCHW"))
    return out_normal - theta * out_diff


if __name__ == "__main__":
    key = jax.random.PRNGKey(0)
    k_x, k_w = jax.random.split(key)

    N, C_in, C_out, H, W = 2, 4, 8, 16, 16
    theta = 0.7

    x = jax.random.normal(k_x, (N, C_in, H, W), dtype=jnp.float32)
    # Deterministic synthetic conv weight (shape of nn.Conv2d(C_in, C_out, 3)).
    w0 = 0.1 * jax.random.normal(k_w, (C_out, C_in, 3, 3), dtype=jnp.float32)

    ref = _reference(x, w0, theta)

    # f32, auto tile (8-row blocks here): exercises the halo path, 4-step grid,
    # single K=9*c_in matmul.
    out = jax.block_until_ready(conv2d_gaussian_fix(x, w0, theta=theta))
    assert out.shape == (N, C_out, H, W), out.shape
    assert jnp.allclose(out, ref, rtol=1e-4, atol=1e-4), "f32/auto-tile mismatch"

    # Whole-image tile (zero-halo path) and the theta == 0 branch.
    out0 = jax.block_until_ready(conv2d_gaussian_fix(x, w0, theta=0.0, tile_h=H))
    assert jnp.allclose(out0, _reference(x, w0, 0.0), rtol=1e-4, atol=1e-4), \
        "theta=0 / whole-image mismatch"

    # Per-tap dot+accumulate path (the c_in >= 128 code path, forced).
    out_taps = jax.block_until_ready(
        conv2d_gaussian_fix(x, w0, theta=theta, single_matmul=False))
    assert jnp.allclose(out_taps, ref, rtol=1e-4, atol=1e-4), "per-tap mismatch"

    # bf16 inputs / f32 MXU accumulation (HBM-traffic optimization, v5e default).
    out_bf = jax.block_until_ready(
        conv2d_gaussian_fix(x, w0, theta=theta, compute_dtype=jnp.bfloat16))
    assert jnp.allclose(out_bf, ref, rtol=5e-2, atol=5e-2), "bf16 mismatch"

    print("KERNEL_OK")
</pallas_src>

<mosaic_0001>
module attributes {stable_mosaic.version = 11 : i64} {
  func.func @kernel(%arg0: i32, %arg1: i32, %arg2: memref<1x4x128xf32, #tpu.memory_space<vmem>>, %arg3: memref<1x1x8x16xf32, #tpu.memory_space<vmem>>, %arg4: memref<8x36xf32, #tpu.memory_space<vmem>>, %arg5: memref<2x128xf32, #tpu.memory_space<vmem>>, %arg6: memref<1x8x128xf32, #tpu.memory_space<vmem>>, %arg7: memref<4x160xf32, #tpu.memory_space<vmem>>) attributes {dimension_semantics = [#tpu.dimension_semantics<parallel>, #tpu.dimension_semantics<parallel>], iteration_bounds = array<i64: 2, 2>, scalar_prefetch = 0 : i64, scratch_operands = 1 : i64, tpu.core_type = #tpu.core_type<tc>, window_params = [{transform_indices = @transform_0, window_bounds = array<i64: 1, 4, 128>}, {transform_indices = @transform_1, window_bounds = array<i64: 1, 1, 8, 16>}, {pipeline_mode = #tpu.pipeline_mode<synchronous>, transform_indices = @transform_2, window_bounds = array<i64: 8, 36>}, {pipeline_mode = #tpu.pipeline_mode<synchronous>, transform_indices = @transform_3, window_bounds = array<i64: 2, 128>}, {transform_indices = @transform_4, window_bounds = array<i64: 1, 8, 128>}]} {
    %c0 = arith.constant 0 : index
    %c0_0 = arith.constant 0 : index
    %c0_1 = arith.constant 0 : index
    %c0_2 = arith.constant 0 : index
    %0 = vector.load %arg3[%c0, %c0_0, %c0_1, %c0_2] : memref<1x1x8x16xf32, #tpu.memory_space<vmem>>, vector<1x1x4x16xf32>
    %1 = vector.shape_cast %0 : vector<1x1x4x16xf32> to vector<4x16xf32>
    %c0_3 = arith.constant 0 : index
    %c0_4 = arith.constant 0 : index
    %2 = vector.load %arg7[%c0_3, %c0_4] : memref<4x160xf32, #tpu.memory_space<vmem>>, vector<4x16xf32>
    tpu.vector_store %arg7[%c0_3, %c0_4], %1 {strides = array<i32>} : memref<4x160xf32, #tpu.memory_space<vmem>>, vector<4x16xf32>,
    %c0_5 = arith.constant 0 : index
    %c0_6 = arith.constant 0 : index
    %c0_7 = arith.constant 0 : index
    %3 = vector.load %arg2[%c0_5, %c0_6, %c0_7] : memref<1x4x128xf32, #tpu.memory_space<vmem>>, vector<1x4x128xf32>
    %4 = vector.shape_cast %3 : vector<1x4x128xf32> to vector<4x128xf32>
    %c0_8 = arith.constant 0 : index
    %c16 = arith.constant 16 : index
    %5 = vector.load %arg7[%c0_8, %c16] : memref<4x160xf32, #tpu.memory_space<vmem>>, vector<4x128xf32>
    tpu.vector_store %arg7[%c0_8, %c16], %4 {strides = array<i32>} : memref<4x160xf32, #tpu.memory_space<vmem>>, vector<4x128xf32>,
    %c0_9 = arith.constant 0 : index
    %c0_10 = arith.constant 0 : index
    %c4 = arith.constant 4 : index
    %c0_11 = arith.constant 0 : index
    %6 = vector.load %arg3[%c0_9, %c0_10, %c4, %c0_11] : memref<1x1x8x16xf32, #tpu.memory_space<vmem>>, vector<1x1x4x16xf32>
    %7 = vector.shape_cast %6 : vector<1x1x4x16xf32> to vector<4x16xf32>
    %c0_12 = arith.constant 0 : index
    %c144 = arith.constant 144 : index
    %8 = vector.load %arg7[%c0_12, %c144] : memref<4x160xf32, #tpu.memory_space<vmem>>, vector<4x16xf32>
    tpu.vector_store %arg7[%c0_12, %c144], %7 {strides = array<i32>} : memref<4x160xf32, #tpu.memory_space<vmem>>, vector<4x16xf32>,
    %c0_13 = arith.constant 0 : index
    %c0_14 = arith.constant 0 : index
    %9 = vector.load %arg5[%c0_13, %c0_14] : memref<2x128xf32, #tpu.memory_space<vmem>>, vector<2x128xf32>
    %10 = vector.extract_strided_slice %9 {offsets = [0, 0], sizes = [1, 128], strides = [1, 1]} : vector<2x128xf32> to vector<1x128xf32>
    %11 = vector.extract_strided_slice %9 {offsets = [1, 0], sizes = [1, 128], strides = [1, 1]} : vector<2x128xf32> to vector<1x128xf32>
    %c0_15 = arith.constant 0 : index
    %c0_16 = arith.constant 0 : index
    %12 = vector.load %arg7[%c0_15, %c0_16] : memref<4x160xf32, #tpu.memory_space<vmem>>, vector<4x128xf32>
    %c1_i32 = arith.constant 1 : i32
    %13 = tpu.dynamic_rotate %12 by %c1_i32 dim 1 : vector<4x128xf32>, i32 -> vector<4x128xf32>
    %14 = vector.broadcast %10 : vector<1x128xf32> to vector<4x128xf32>
    %15 = arith.mulf %13, %14 : vector<4x128xf32>
    %c127_i32 = arith.constant 127 : i32
    %16 = tpu.dynamic_rotate %12 by %c127_i32 dim 1 : vector<4x128xf32>, i32 -> vector<4x128xf32>
    %17 = vector.broadcast %11 : vector<1x128xf32> to vector<4x128xf32>
    %18 = arith.mulf %16, %17 : vector<4x128xf32>
    %c0_17 = arith.constant 0 : index
    %c16_18 = arith.constant 16 : index
    %19 = vector.load %arg7[%c0_17, %c16_18] : memref<4x160xf32, #tpu.memory_space<vmem>>, vector<4x128xf32>
    %c1_i32_19 = arith.constant 1 : i32
    %20 = tpu.dynamic_rotate %19 by %c1_i32_19 dim 1 : vector<4x128xf32>, i32 -> vector<4x128xf32>
    %21 = vector.broadcast %10 : vector<1x128xf32> to vector<4x128xf32>
    %22 = arith.mulf %20, %21 : vector<4x128xf32>
    %c127_i32_20 = arith.constant 127 : i32
    %23 = tpu.dynamic_rotate %19 by %c127_i32_20 dim 1 : vector<4x128xf32>, i32 -> vector<4x128xf32>
    %24 = vector.broadcast %11 : vector<1x128xf32> to vector<4x128xf32>
    %25 = arith.mulf %23, %24 : vector<4x128xf32>
    %c0_21 = arith.constant 0 : index
    %c32 = arith.constant 32 : index
    %26 = vector.load %arg7[%c0_21, %c32] : memref<4x160xf32, #tpu.memory_space<vmem>>, vector<4x128xf32>
    %c1_i32_22 = arith.constant 1 : i32
    %27 = tpu.dynamic_rotate %26 by %c1_i32_22 dim 1 : vector<4x128xf32>, i32 -> vector<4x128xf32>
    %28 = vector.broadcast %10 : vector<1x128xf32> to vector<4x128xf32>
    %29 = arith.mulf %27, %28 : vector<4x128xf32>
    %c127_i32_23 = arith.constant 127 : i32
    %30 = tpu.dynamic_rotate %26 by %c127_i32_23 dim 1 : vector<4x128xf32>, i32 -> vector<4x128xf32>
    %31 = vector.broadcast %11 : vector<1x128xf32> to vector<4x128xf32>
    %32 = arith.mulf %30, %31 : vector<4x128xf32>
    %33 = tpu.concatenate %15, %12, %18, %22, %19, %25, %29, %26, %32 in 0 : vector<4x128xf32>, vector<4x128xf32>, vector<4x128xf32>, vector<4x128xf32>, vector<4x128xf32>, vector<4x128xf32>, vector<4x128xf32>, vector<4x128xf32>, vector<4x128xf32> -> vector<36x128xf32>
    %c0_24 = arith.constant 0 : index
    %c0_25 = arith.constant 0 : index
    %34 = vector.load %arg4[%c0_24, %c0_25] : memref<8x36xf32, #tpu.memory_space<vmem>>, vector<8x36xf32>
    %cst = arith.constant dense<0.000000e+00> : vector<8x128xf32>
    %35 = tpu.matmul %34, %33, %cst {dimension_numbers = #tpu.dot_dimension_numbers<[1], [0], [0], [1], [0, 0, 1, 1], [], []>} : vector<8x36xf32>, vector<36x128xf32>, vector<8x128xf32> -> vector<8x128xf32>
    %c0_26 = arith.constant 0 : index
    %c0_27 = arith.constant 0 : index
    %c0_28 = arith.constant 0 : index
    %36 = vector.load %arg6[%c0_26, %c0_27, %c0_28] : memref<1x8x128xf32, #tpu.memory_space<vmem>>, vector<1x8x128xf32>
    %37 = vector.shape_cast %36 : vector<1x8x128xf32> to vector<8x128xf32>
    %38 = vector.shape_cast %35 : vector<8x128xf32> to vector<1x8x128xf32>
    tpu.vector_store %arg6[%c0_26, %c0_27, %c0_28], %38 {strides = array<i32>} : memref<1x8x128xf32, #tpu.memory_space<vmem>>, vector<1x8x128xf32>,
    return
  }
  func.func @transform_0(%arg0: i32, %arg1: i32) -> (i32, i32, i32) {
    %c0_i32 = arith.constant 0 : i32
    %c0_i32_0 = arith.constant 0 : i32
    return %arg0, %c0_i32, %arg1 : i32, i32, i32
  }
  func.func @transform_1(%arg0: i32, %arg1: i32) -> (i32, i32, i32, i32) {
    %c0_i32 = arith.constant 0 : i32
    %c0_i32_0 = arith.constant 0 : i32
    %c0_i32_1 = arith.constant 0 : i32
    return %arg0, %arg1, %c0_i32, %c0_i32_0 : i32, i32, i32, i32
  }
  func.func @transform_2(%arg0: i32, %arg1: i32) -> (i32, i32) {
    %c0_i32 = arith.constant 0 : i32
    %c0_i32_0 = arith.constant 0 : i32
    %c0_i32_1 = arith.constant 0 : i32
    return %c0_i32, %c0_i32_0 : i32, i32
  }
  func.func @transform_3(%arg0: i32, %arg1: i32) -> (i32, i32) {
    %c0_i32 = arith.constant 0 : i32
    %c0_i32_0 = arith.constant 0 : i32
    %c0_i32_1 = arith.constant 0 : i32
    return %c0_i32, %c0_i32_0 : i32, i32
  }
  func.func @transform_4(%arg0: i32, %arg1: i32) -> (i32, i32, i32) {
    %c0_i32 = arith.constant 0 : i32
    %c0_i32_0 = arith.constant 0 : i32
    return %arg0, %c0_i32, %arg1 : i32, i32, i32
  }
}

</mosaic_0001>

<bundles_post_ra>
// kernel: conv2d_gaussian_fix.1
= control target key start
LH: loop header
LB: loop body
LE: loop exit
PB: predicated region body
PF: predicated region fallthrough
CT: control target
= control target key end

     0   :  { %s685_s15 = smov 0   ;;  %s687_s16 = smov 0   ;;  %s758_s0 = inlined_call_operand.vmem [shape: f32[2,4,256], index: 0, kind: input, shape index: {}]   ;;  %s759_s1 = inlined_call_operand.vmem [shape: f32[2,2,8,16], index: 1, kind: input, shape index: {}]   ;;  %s760_s2 = inlined_call_operand.vmem [shape: f32[8,36], index: 2, kind: input, shape index: {}]   ;;  %s761_s3 = inlined_call_operand.vmem [shape: f32[2,128], index: 3, kind: input, shape index: {}]   ;;  %s762_s4 = inlined_call_operand.vmem [shape: f32[2,8,256], index: 4, kind: output, shape index: {}]  }
   0x1   :  { %s689_s17 = smov 0   ;;  %s691_s18 = smov 0  }
   0x2   :  { %s693_s19 = smov 0  }
   0x3 LB: > { %s23_s20 = sadd.s32 1, %s643_s17  ;;  %s26_s21 = sadd.s32 1, %s647_s18  ;;  %s651_s19 = sphi %s693_s19, %s14_s19   ;;  %s647_s18 = sphi %s691_s18, %s766_s18   ;;  %s643_s17 = sphi %s689_s17, %s765_s17   ;;  %s639_s16 = sphi %s687_s16, %s764_s16   ;;  %s635_s15 = sphi %s685_s15, %s763_s15  }
   0x4   : > { %p24_p0 = scmp.ge.s32.totalorder %s23_s20, 2  ;;  %p533_p1 = scmp.ge.s32.totalorder %s651_s19, 1 }
   0x5   : > { %p196_p2 = scmp.lt.s32.totalorder %s651_s19, 5 }
   0x6   : > { %s768_s20 = smov (%p24_p0, %s23_s20), 0  ;;  %s770_s21 = smov (!%p24_p0, %s26_s21), %s647_s18 }
   0x7   : > { %p197_p3 = pnand %p533_p1, %p196_p2  ;;  %p28_p4 = scmp.ge.s32.totalorder %s770_s21, 2 }
   0x8   : > { %p236_p5 = scmp.lt.s32.totalorder (!%p197_p3), %s639_s16, 1  ;;  %p238_p6 = scmp.lt.s32.totalorder (!%p197_p3), %s635_s15, 1 }
   0x9   : > { %s772_s21 = smov (%p28_p4, %s770_s21), 0  ;;  %200 = sbr.rel (%p197_p3) target bundleno = 593 (0x251), region = 36 }
   0xa   : > { %s653_s6 = smov (!%p197_p3), 16   ;;  %s654_s7 = smov (!%p197_p3), 112  }
   0xb   : > { %s655_s8 = smov (!%p197_p3), 96   ;;  %s657_s9 = smov (!%p197_p3), 127  }
   0xc   : > { %s659_s10 = smov (!%p197_p3), 1  }
   0xe   : > { %s774_s16 = smov (!%p236_p5, %s639_s16), 1  ;;  %s776_s15 = smov (!%p238_p6, %s635_s15), 1  ;;  %vm261_vm0 = vcmask 125952   ;;  %vm271_vm1 = vcmask 1043584   ;;  %vm272_vm2 = vcmask 130052   ;;  %vm268_vm3 = vcmask 130048  }
   0xf   : > { %s534_s22 = sshll.u32 %s774_s16, 1  ;;  %vm273_vm4 = vmor %vm272_vm2, %vm271_vm1  ;;  %vm280_vm5 = vcmask 257152   ;;  %v656_v10 = vmov 0.0   ;;  %vm318_vm6 = vcmask 785408   ;;  %vm305_vm7 = vcmask 916480   ;;  %v346_v45 = vld [vmem:[%s760_s2] sm:$0xff] }
  0x10   : > { %s715_s23 = sadd.s32 %s534_s22, %s776_s15  ;;  %550 = vmatprep.subr.mxu0 %v656_v10  ;;  %vm658_vm8 = vmmov 0   ;;  %v286_v20 = vlaneseq  ;;  %v282_v23 = vld [vmem:[%s761_s3] sm:$0x3]  ;;  %vm341_vm9 = vcmask 1043456   ;;  %vm347_vm10 = vcmask 293888  }
  0x11   : > { %s535_s24 = sshll.u32 %s715_s23, 2  ;;  %s537_s25 = sshll.u32 %s715_s23, 3  ;;  %560 = vmatprep.mubr.msk.f32.mxu0 %vm658_vm8, %v656_v10 }
  0x12   : > { %s243_s28 = scalar_lea.vmem %s758_s0, %s535_s24  ;;  %s251_s5 = scalar_lea.vmem %s759_s1, %s537_s25  ;;  %v287_v21 = vshrl.u32 %v286_v20, 7 }
  0x13   : > { %v263_v0 = vld [vmem:[%s243_s28] sm:$0xf]  ;;  %v275_v2 = vld [vmem:[%s251_s5 + $0x4] sm:$0xf]  ;;  %s259_s22 = scalar_lea.vmem %s762_s4, %s537_s25 }
  0x14   : > { %v260_v1 = vld [vmem:[%s251_s5] sm:$0xf]  ;;  %265 = vrot.lane.b32.xlu0 %v263_v0, %s653_s6  ;;  %v295_v22 = vsub.s32 1, %v287_v21  ;;  %v288_v25 = vsub.s32 0, %v287_v21 }
  0x15   : > { %262 = vst.msk [vmem:[#allocation2] sm:$0xf] %vm261_vm0, %v260_v1 }
  0x16   : > { %v296_v24 = vrot.slane %v282_v23, %v295_v22  ;;  %v289_v28 = vrot.slane %v282_v23, %v288_v25 }
  0x18   : > { %277 = vrot.lane.b32.xlu0 %v275_v2, %s653_s6 }
  0x86   : > { %v266_v3 = vpop.permute.xlu0 %265 }
  0x87   : > { %v267_v4 = vrot.slane %v266_v3, 4 }
  0x89   : > { %v269_v5 = vsel %vm268_vm3, %v267_v4, %v266_v3 }
  0x8a   : > { %274 = vst.msk [vmem:[#allocation2] sm:$0xff] %vm273_vm4, %v269_v5  ;;  %v278_v6 = vpop.permute.xlu0 %277 }
  0x8b   : > { %281 = vst.msk [vmem:[#allocation2 + $0x4] sm:$0xf] %vm280_vm5, %v278_v6 }
  0x91   : > { %v283_v19 = vld [vmem:[#allocation2] sm:$0xf] }
  0x92   : > { %v298_v7 = vld [vmem:[#allocation2] sm:$0xff]  ;;  %v328_v42 = vcombine.low %v283_v19, %v283_v19 }
  0x93   : > { %301 = vrot.lane.b32.xlu0 %v298_v7, %s654_s7  ;;  %314 = vrot.lane.b32.xlu1 %v298_v7, %s655_s8  ;;  %v300_v8 = vcombine.high %v298_v7, %v298_v7  ;;  %v336_v9 = vcombine.low %v298_v7, %v298_v7 }
  0x97   : > { %316 = vrot.lane.b32.xlu1 %v300_v8, %s655_s8 }
  0x9b   : > { %303 = vrot.lane.b32.xlu1 %v300_v8, %s654_s7 }
  0x9f   : > { %337 = vrot.lane.b32.xlu1 %v336_v9, %s655_s8 }
 0x105   : > { %v315_v11 = vpop.permute.xlu1 %314  ;;  %v302_v14 = vpop.permute.xlu0 %301 }
 0x109   : > { %v317_v12 = vpop.permute.xlu1 %316 }
 0x10a   : > { %v319_v13 = vsel %vm318_vm6, %v315_v11, %v317_v12 }
 0x10b   : > { %324 = vrot.lane.b32.xlu0 %v319_v13, %s657_s9 }
 0x10d   : > { %v304_v15 = vpop.permute.xlu1 %303 }
 0x10e   : > { %v306_v16 = vsel %vm305_vm7, %v302_v14, %v304_v15 }
 0x10f   : > { %321 = vrot.lane.b32.xlu0 %v319_v13, %s659_s10  ;;  %311 = vrot.lane.b32.xlu1 %v306_v16, %s657_s9 }
 0x111   : > { %v338_v17 = vpop.permute.xlu1 %337 }
 0x112   : > { %v339_v18 = vsel %vm318_vm6, %v338_v17, %v315_v11 }
 0x113   : > { %308 = vrot.lane.b32.xlu0 %v306_v16, %s659_s10  ;;  %291 = vrot.lane.b32.xlu1 %v283_v19, %s657_s9 }
 0x117   : > { %284 = vrot.lane.b32.xlu0 %v283_v19, %s659_s10 }
 0x17d   : > { %v325_v26 = vpop.permute.xlu0 %324 }
 0x17e   : > { %v326_v27 = vmul.f32 %v325_v26, %v296_v24 }
 0x180   : > { %551 = vmatpush3.msk.msra.mxu0 %vm341_vm9, %v326_v27 }
 0x181   : > { %v322_v29 = vpop.permute.xlu0 %321  ;;  %v312_v30 = vpop.permute.xlu1 %311  ;;  %552 = vmatprep.subr.mxu0 %v656_v10 }
 0x182   : > { %v323_v31 = vmul.f32 %v322_v29, %v289_v28  ;;  %v313_v32 = vmul.f32 %v312_v30, %v296_v24 }
 0x184   : > { %v334_v33 = vrot.slane %v313_v32, 4  ;;  %v345_v34 = vsel %vm341_vm9, %v323_v31, %v339_v18 }
 0x185   : > { %v309_v35 = vpop.permute.xlu0 %308  ;;  %553 = vmatpush3.msra.mxu0 %v345_v34  ;;  %v292_v36 = vpop.permute.xlu1 %291 }
 0x186   : > { %v310_v37 = vmul.f32 %v309_v35, %v289_v28  ;;  %554 = vmatprep.subr.mxu0 %v656_v10  ;;  %v344_v38 = vsel %vm341_vm9, %v306_v16, %v334_v33  ;;  %v297_v40 = vmul.f32 %v296_v24, %v292_v36 }
 0x187   : > { %555 = vmatpush3.msra.mxu0 %v344_v38 }
 0x188   : > { %v331_v39 = vrot.slane %v310_v37, 4  ;;  %556 = vmatprep.subr.mxu0 %v656_v10 }
 0x189   : > { %v285_v41 = vpop.permute.xlu0 %284 }
 0x18a   : > { %v290_v43 = vmul.f32 %v289_v28, %v285_v41  ;;  %v343_v44 = vsel %vm341_vm9, %v297_v40, %v331_v39 }
 0x18b   : > { %557 = vmatpush3.msra.mxu0 %v343_v44 }
 0x18c   : > { %558 = vmatprep.subr.mxu0 %v656_v10  ;;  %v342_v46 = vsel %vm341_vm9, %v290_v43, %v328_v42 }
 0x18d   : > { %559 = vmatpush3.msra.mxu0 %v342_v46 }
 0x18e   : > { %561 = vmatmul.mubr.msk.f32.vlgmr.msra.gmra.mxu0 %vm347_vm10, %v346_v45 }
 0x24e   : > { %v420_v47 = vpop.f32.mrf.mxu0 }
 0x24f   : > { %424 = vst [vmem:[%s259_s22] sm:$0xff] %v420_v47 }
 0x250   : > { %v562_v48 = vpop.f32.mrf.mxu0 }
 0x251 PF: > { %s14_s19 = sadd.s32 1, %s651_s19   ;;  %s763_s15 = smov %s643_s17 }
 0x252   : > { %p11_p7 = scmp.ge.s32.totalorder %s14_s19, 6   ;;  %s764_s16 = smov %s647_s18 }
 0x253   : > { %s765_s17 = smov %s768_s20  ;;  %s766_s18 = smov %s772_s21 }
 0x254   :  { %13 = sbr.rel (!%p11_p7) target bundleno = 3 (0x3), region = 69 }

</bundles_post_ra>
